<compile_context>
chip_gen: v6e
topology: v6e:2x2x1
jax: 0.10.0
libtpu: 0.0.40
codegen_flags: <defaults>
</compile_context>

<pallas_src>
import math
import jax
import jax.numpy as jnp
from jax import lax
from jax.experimental import pallas as pl
from jax.experimental.pallas import tpu as pltpu

LANE = 128


def _round_up(x, m):
    return ((x + m - 1) // m) * m


# ---------------------------------------------------------------------------
# Pallas kernel: fused (im2col-matmul + bias + ReLU), one M-tile per grid step
# ---------------------------------------------------------------------------
def _conv_matmul_relu_kernel(p_ref, w_ref, b_ref, o_ref):
    # p_ref: (tm, K)      bf16   -- im2col patches tile
    # w_ref: (K, 128)     bf16   -- flattened conv weight, Cout padded to 128
    # b_ref: (1, 128)     f32    -- bias padded to 128
    # o_ref: (tm, 128)    f32    -- lane-dense output tile
    acc = jnp.dot(p_ref[...], w_ref[...], preferred_element_type=jnp.float32)
    o_ref[...] = jnp.maximum(acc + b_ref[...], 0.0).astype(o_ref.dtype)


def dqn_forward(x, weight, bias, *, stride=4, tm=1024):
    """
    x:      (N, 18, H, W)  float32, NCHW (PyTorch convention)
    weight: (64, 18, 8, 8) float32 (PyTorch Conv2d OIHW weight layout)
    bias:   (64,)          float32
    returns (N, 64, OH, OW) float32, NCHW
    """
    n, c_in, h, w = x.shape
    c_out, c_in_w, kh, kw = weight.shape
    assert c_in == c_in_w
    oh = (h - kh) // stride + 1
    ow = (w - kw) // stride + 1

    # --- Patch extraction: single XLA gather-conv, bf16 to halve HBM traffic.
    # Output channel flattening order is (C_in, KH, KW) (channel-major), which
    # matches weight.reshape(c_out, c_in*kh*kw). Output layout NHWC so the
    # channel/patch dim is already last (lane dim) — no extra transpose.
    x_bf16 = x.astype(jnp.bfloat16)
    patches = lax.conv_general_dilated_patches(
        x_bf16,
        filter_shape=(kh, kw),
        window_strides=(stride, stride),
        padding="VALID",
        dimension_numbers=("NCHW", "OIHW", "NHWC"),
    )                                                     # (N, OH, OW, K)
    k = c_in * kh * kw
    m = n * oh * ow
    patches = patches.reshape(m, k)                       # (M, K), bf16

    # --- Weight / bias: flatten, cast to bf16, pad Cout 64 -> 128 (lane dense).
    c_out_p = _round_up(c_out, LANE)
    w_flat = weight.reshape(c_out, k).T.astype(jnp.bfloat16)        # (K, 64)
    w_flat = jnp.pad(w_flat, ((0, 0), (0, c_out_p - c_out)))        # (K, 128)
    b_row = jnp.pad(bias.astype(jnp.float32),
                    (0, c_out_p - c_out)).reshape(1, c_out_p)       # (1, 128)

    # --- Tile M; pad rows so the grid divides evenly (padded rows sliced off).
    tm = min(tm, _round_up(m, 8))          # small inputs -> single small tile
    mp = _round_up(m, tm)
    if mp != m:
        patches = jnp.pad(patches, ((0, mp - m), (0, 0)))

    grid = (mp // tm,)
    cost = pl.CostEstimate(
        flops=2 * mp * k * c_out_p,
        transcendentals=0,
        bytes_accessed=mp * k * 2 + k * c_out_p * 2 + mp * c_out_p * 4,
    )

    out_padded = pl.pallas_call(
        _conv_matmul_relu_kernel,
        out_shape=jax.ShapeDtypeStruct((mp, c_out_p), jnp.float32),
        grid_spec=pltpu.PrefetchScalarGridSpec(
            num_scalar_prefetch=0,
            grid=grid,
            in_specs=[
                pl.BlockSpec((tm, k), lambda i: (i, 0)),        # patches tile
                pl.BlockSpec((k, c_out_p), lambda i: (0, 0)),   # whole weight
                pl.BlockSpec((1, c_out_p), lambda i: (0, 0)),   # bias row
            ],
            out_specs=pl.BlockSpec((tm, c_out_p), lambda i: (i, 0)),
        ),
        compiler_params=pltpu.CompilerParams(
            dimension_semantics=("parallel",)),
        cost_estimate=cost,
    )(patches, w_flat, b_row)

    out = out_padded[:m, :c_out]                           # drop row/col pad
    out = out.reshape(n, oh, ow, c_out).transpose(0, 3, 1, 2)   # back to NCHW
    return out


# ---------------------------------------------------------------------------
# Deterministic parameter init (mimics PyTorch Conv2d default: U(-b, b))
# ---------------------------------------------------------------------------
def init_params(key, c_in=18, c_out=64, kh=8, kw=8):
    fan_in = c_in * kh * kw
    bound = 1.0 / math.sqrt(fan_in)
    kw_key, kb_key = jax.random.split(key)
    weight = jax.random.uniform(kw_key, (c_out, c_in, kh, kw),
                                minval=-bound, maxval=bound, dtype=jnp.float32)
    bias = jax.random.uniform(kb_key, (c_out,),
                              minval=-bound, maxval=bound, dtype=jnp.float32)
    return weight, bias


if __name__ == "__main__":
    key = jax.random.PRNGKey(0)
    k_x, k_p = jax.random.split(key)

    # Small shapes consistent with the module: N=2, C_in=18, spatial 16x16.
    x = jax.random.normal(k_x, (2, 18, 16, 16), dtype=jnp.float32)
    weight, bias = init_params(k_p)

    out = dqn_forward(x, weight, bias, stride=4)
    out = jax.block_until_ready(out)

    # Reference check against true-f32 XLA conv (tolerance loosened because the
    # kernel feeds the MXU bf16 inputs with f32 accumulation).
    ref = jax.lax.conv_general_dilated(
        x, weight, window_strides=(4, 4), padding="VALID",
        dimension_numbers=("NCHW", "OIHW", "NCHW"),
        precision=jax.lax.Precision.HIGHEST)
    ref = jax.nn.relu(ref + bias.reshape(1, -1, 1, 1))
    assert out.shape == (2, 64, 3, 3)
    assert jnp.allclose(out, ref, atol=2e-2, rtol=2e-2)

    print("KERNEL_OK")
</pallas_src>

<mosaic_0001>
module attributes {stable_mosaic.version = 11 : i64} {
  func.func @_conv_matmul_relu_kernel(%arg0: i32, %arg1: memref<24x1152xbf16, #tpu.memory_space<vmem>>, %arg2: memref<1152x128xbf16, #tpu.memory_space<vmem>>, %arg3: memref<1x128xf32, #tpu.memory_space<vmem>>, %arg4: memref<24x128xf32, #tpu.memory_space<vmem>>) attributes {dimension_semantics = [#tpu.dimension_semantics<parallel>], iteration_bounds = array<i64: 1>, scalar_prefetch = 0 : i64, scratch_operands = 0 : i64, tpu.core_type = #tpu.core_type<tc>, window_params = [{transform_indices = @transform_0, window_bounds = array<i64: 24, 1152>}, {pipeline_mode = #tpu.pipeline_mode<synchronous>, transform_indices = @transform_1, window_bounds = array<i64: 1152, 128>}, {pipeline_mode = #tpu.pipeline_mode<synchronous>, transform_indices = @transform_2, window_bounds = array<i64: 1, 128>}, {transform_indices = @transform_3, window_bounds = array<i64: 24, 128>}]} {
    %c0 = arith.constant 0 : index
    %c0_0 = arith.constant 0 : index
    %0 = vector.load %arg1[%c0, %c0_0] : memref<24x1152xbf16, #tpu.memory_space<vmem>>, vector<24x1152xbf16>
    %c0_1 = arith.constant 0 : index
    %c0_2 = arith.constant 0 : index
    %1 = vector.load %arg2[%c0_1, %c0_2] : memref<1152x128xbf16, #tpu.memory_space<vmem>>, vector<1152x128xbf16>
    %cst = arith.constant dense<0.000000e+00> : vector<24x128xf32>
    %2 = tpu.matmul %0, %1, %cst {dimension_numbers = #tpu.dot_dimension_numbers<[1], [0], [0], [1], [0, 0, 1, 1], [], []>} : vector<24x1152xbf16>, vector<1152x128xbf16>, vector<24x128xf32> -> vector<24x128xf32>
    %c0_3 = arith.constant 0 : index
    %c0_4 = arith.constant 0 : index
    %3 = vector.load %arg3[%c0_3, %c0_4] : memref<1x128xf32, #tpu.memory_space<vmem>>, vector<1x128xf32>
    %4 = vector.broadcast %3 : vector<1x128xf32> to vector<24x128xf32>
    %5 = arith.addf %2, %4 : vector<24x128xf32>
    %cst_5 = arith.constant 0.000000e+00 : f32
    %6 = vector.broadcast %cst_5 : f32 to vector<24x128xf32>
    %7 = arith.maximumf %5, %6 : vector<24x128xf32>
    %c0_6 = arith.constant 0 : index
    %c0_7 = arith.constant 0 : index
    %8 = vector.load %arg4[%c0_6, %c0_7] : memref<24x128xf32, #tpu.memory_space<vmem>>, vector<24x128xf32>
    tpu.vector_store %arg4[%c0_6, %c0_7], %7 {strides = array<i32>} : memref<24x128xf32, #tpu.memory_space<vmem>>, vector<24x128xf32>,
    return
  }
  func.func @transform_0(%arg0: i32) -> (i32, i32) {
    %c0_i32 = arith.constant 0 : i32
    %c0_i32_0 = arith.constant 0 : i32
    return %arg0, %c0_i32 : i32, i32
  }
  func.func @transform_1(%arg0: i32) -> (i32, i32) {
    %c0_i32 = arith.constant 0 : i32
    %c0_i32_0 = arith.constant 0 : i32
    %c0_i32_1 = arith.constant 0 : i32
    return %c0_i32, %c0_i32_0 : i32, i32
  }
  func.func @transform_2(%arg0: i32) -> (i32, i32) {
    %c0_i32 = arith.constant 0 : i32
    %c0_i32_0 = arith.constant 0 : i32
    %c0_i32_1 = arith.constant 0 : i32
    return %c0_i32, %c0_i32_0 : i32, i32
  }
  func.func @transform_3(%arg0: i32) -> (i32, i32) {
    %c0_i32 = arith.constant 0 : i32
    %c0_i32_0 = arith.constant 0 : i32
    return %arg0, %c0_i32 : i32, i32
  }
}

</mosaic_0001>

<bundles_post_ra>
// kernel: tpu_custom_call.1
= control target key start
LH: loop header
LB: loop body
LE: loop exit
PB: predicated region body
PF: predicated region fallthrough
CT: control target
= control target key end

     0   :  { %8 = vsyncpa [#allocation3], 0  ;;  %s1427_s0 = inlined_call_operand.hbm [shape: bf16[24,1152], index: 0, kind: input, shape index: {}]   ;;  %s1428_s1 = inlined_call_operand.hbm [shape: bf16[1152,128], index: 1, kind: input, shape index: {}]   ;;  %s1429_s2 = inlined_call_operand.vmem [shape: f32[1,128], index: 2, kind: input, shape index: {}]   ;;  %s1430_s3 = inlined_call_operand.hbm [shape: f32[24,128], index: 3, kind: output, shape index: {}]  }
   0x1   :  { %9 = vsyncpa [#allocation6], 0 }
   0x2   :  { %10 = vsyncpa [#allocation4], 0  ;;  %s1386_s12 = smov [#allocation2]  }
   0x3   :  { %s16_s13 = sshll.u32 %s1386_s12, 4  ;;  %s17_s13 = int_to_ptr.vmem [resolvable:$true] %s16_s13 }
   0x4   :  { %s1328_s14 = scalar_lea.vmem %s17_s13, 1728  ;;  %p1333_p1 = scmp.lt.s32.totalorder %s17_s13, %s17_s13 }
   0x5   :  { %p1329_p0 = scmp.ne.s32.totalorder %s17_s13, %s1328_s14  ;;  %p1334_p2 = scmp.lt.s32.totalorder %s1328_s14, %s1328_s14 }
   0x7   :  { %p1335_p3 = por %p1334_p2, %p1333_p1 }
   0x9   :  { %p1336_p4 = pnand %p1335_p3, %p1329_p0 }
   0xb   :  { %1339 = shalt.err (!%p1336_p4)
}
   0xc   :  { %s1387_s15 = smov 576   ;;  %s1388_s16 = smov 36  }
   0xd   :  { %22 = dma.hbm_to_vmem [thread:$0]  %s1427_s0, 1728, %s17_s13, [#allocation3], %s1387_s15, %s1387_s15, %s1388_s16  }
   0xe   :  { %s1389_s19 = smov [#allocation5]  }
   0xf   :  { %s28_s20 = sshll.u32 %s1389_s19, 4  ;;  %s29_s20 = int_to_ptr.vmem [resolvable:$true] %s28_s20 }
  0x10   :  { %s1348_s21 = scalar_lea.vmem %s29_s20, 9216  ;;  %p1353_p6 = scmp.lt.s32.totalorder %s29_s20, %s29_s20 }
  0x11   :  { %p1349_p5 = scmp.ne.s32.totalorder %s29_s20, %s1348_s21  ;;  %p1354_p7 = scmp.lt.s32.totalorder %s1348_s21, %s1348_s21 }
  0x13   :  { %p1355_p8 = por %p1354_p7, %p1353_p6 }
  0x15   :  { %p1356_p9 = pnand %p1355_p8, %p1349_p5 }
  0x17   :  { %1359 = shalt.err (!%p1356_p9)
}
  0x18   :  { %s1390_s22 = smov 64   ;;  %s1391_s23 = smov 4  }
  0x19   :  { %34 = dma.hbm_to_vmem [thread:$0]  %s1428_s1, 9216, %s29_s20, [#allocation6], %s1390_s22, %s1390_s22, %s1391_s23  }
  0x1a   :  { %1380 = dma.done.wait [#allocation3], 1728  }
  0x1b   :  { %1381 = vsyncadd [#allocation3], 4294965568 }
  0x1c   :  { %1382 = dma.done.wait [#allocation6], 9216  }
  0x1d   :  { %1383 = vsyncadd [#allocation6], 4294958080  ;;  %v1226_v0 = vld [vmem:[#allocation5 + $0x78] sm:$0xff]   ;;  %v1230_v4 = vld [vmem:[#allocation5 + $0x70] sm:$0xff]  }
  0x1e   :  { %v1227_v1 = vld [vmem:[#allocation5 + $0x38] sm:$0xff]   ;;  %1075 = vmatprep.subr.bf16.mxu0 %v1226_v0  ;;  %v1231_v5 = vld [vmem:[#allocation5 + $0x30] sm:$0xff]   ;;  %v1234_v8 = vld [vmem:[#allocation5 + $0x68] sm:$0xff]  }
  0x1f   :  { %v1228_v2 = vld [vmem:[#allocation5 + $0xf8] sm:$0xff]   ;;  %1076 = vmatpush3.bf16.msra.mxu0 %v1227_v1  ;;  %v1232_v6 = vld [vmem:[#allocation5 + $0xf0] sm:$0xff]   ;;  %v1235_v9 = vld [vmem:[#allocation5 + $0x28] sm:$0xff]  }
  0x20   :  { %v1229_v3 = vld [vmem:[#allocation5 + $0xb8] sm:$0xff]   ;;  %1103 = vmatprep.subr.bf16.mxu1 %v1228_v2  ;;  %1077 = vmatprep.subr.bf16.mxu0 %v1230_v4  ;;  %v1233_v7 = vld [vmem:[#allocation5 + $0xb0] sm:$0xff]   ;;  %v1236_v10 = vld [vmem:[#allocation5 + $0xe8] sm:$0xff]  }
  0x21   :  { %1104 = vmatpush3.bf16.msra.mxu1 %v1229_v3  ;;  %v1237_v11 = vld [vmem:[#allocation5 + $0xa8] sm:$0xff]   ;;  %v1238_v12 = vld [vmem:[#allocation5 + $0x60] sm:$0xff]   ;;  %v1242_v16 = vld [vmem:[#allocation5 + $0x58] sm:$0xff]  }
  0x22   :  { %1105 = vmatprep.subr.bf16.mxu1 %v1232_v6  ;;  %v1239_v13 = vld [vmem:[#allocation5 + $0x20] sm:$0xff]   ;;  %v1243_v17 = vld [vmem:[#allocation5 + $0x18] sm:$0xff]   ;;  %v1246_v20 = vld [vmem:[#allocation5 + $0x50] sm:$0xff]  }
  0x23   :  { %1078 = vmatpush3.bf16.msra.mxu0 %v1231_v5  ;;  %v1240_v14 = vld [vmem:[#allocation5 + $0xe0] sm:$0xff]   ;;  %v1244_v18 = vld [vmem:[#allocation5 + $0xd8] sm:$0xff]   ;;  %v1247_v21 = vld [vmem:[#allocation5 + $0x10] sm:$0xff]  }
  0x24   :  { %1079 = vmatprep.subr.bf16.mxu0 %v1234_v8  ;;  %v1241_v15 = vld [vmem:[#allocation5 + $0xa0] sm:$0xff]   ;;  %v1245_v19 = vld [vmem:[#allocation5 + $0x98] sm:$0xff]   ;;  %v1248_v22 = vld [vmem:[#allocation5 + $0xd0] sm:$0xff]  }
  0x25   :  { %1106 = vmatpush3.bf16.msra.mxu1 %v1233_v7  ;;  %v1249_v23 = vld [vmem:[#allocation5 + $0x90] sm:$0xff]   ;;  %v1250_v24 = vld [vmem:[#allocation5 + $0x48] sm:$0xff]   ;;  %v1254_v28 = vld [vmem:[#allocation5 + $0x40] sm:$0xff]  }
  0x26   :  { %1107 = vmatprep.subr.bf16.mxu1 %v1236_v10  ;;  %v1251_v25 = vld [vmem:[#allocation5 + $0x8] sm:$0xff]   ;;  %v1255_v29 = vld [vmem:[#allocation5] sm:$0xff]   ;;  %v1257_v31 = vld [vmem:[#allocation2] ss:$36 sps:$4 sm:$0xff]  }
  0x27   :  { %1080 = vmatpush3.bf16.msra.mxu0 %v1235_v9  ;;  %v1252_v26 = vld [vmem:[#allocation5 + $0xc8] sm:$0xff]   ;;  %v1256_v30 = vld [vmem:[#allocation5 + $0xc0] sm:$0xff]   ;;  %v1259_v32 = vld [vmem:[#allocation2 + $0x4] ss:$36 sps:$4 sm:$0xff]  }
  0x28   :  { %1081 = vmatprep.subr.bf16.mxu0 %v1238_v12  ;;  %v1253_v27 = vld [vmem:[#allocation5 + $0x88] sm:$0xff]   ;;  %v1260_v33 = vld [vmem:[#allocation5 + $0x80] sm:$0xff]   ;;  %752 = vmatprep.mubr.bf16.mxu0 %v1259_v32  ;;  %v1261_v34 = vld [vmem:[#allocation5 + $0x178] sm:$0xff]  }
  0x29   :  { %1108 = vmatpush3.bf16.msra.mxu1 %v1237_v11  ;;  %v1262_v35 = vld [vmem:[#allocation2 + $0x8] ss:$36 sps:$4 sm:$0xff]   ;;  %v1268_v40 = vld [vmem:[#allocation5 + $0x170] sm:$0xff]   ;;  %v1272_v44 = vld [vmem:[#allocation5 + $0x168] sm:$0xff]  }
  0x2a   :  { %1109 = vmatprep.subr.bf16.mxu1 %v1240_v14  ;;  %v1264_v36 = vld [vmem:[#allocation2 + $0xc] ss:$36 sps:$4 sm:$0xff]   ;;  %v1265_v37 = vld [vmem:[#allocation5 + $0x138] sm:$0xff]   ;;  %v1269_v41 = vld [vmem:[#allocation5 + $0x130] sm:$0xff]  }
  0x2b   :  { %1082 = vmatpush3.bf16.msra.mxu0 %v1239_v13  ;;  %800 = vmatprep.mubr.bf16.mxu1 %v1264_v36  ;;  %v1266_v38 = vld [vmem:[#allocation5 + $0x1f8] sm:$0xff]   ;;  %v1270_v42 = vld [vmem:[#allocation5 + $0x1f0] sm:$0xff]   ;;  %v1273_v45 = vld [vmem:[#allocation5 + $0x128] sm:$0xff]  }
  0x2c   :  { %1083 = vmatprep.subr.bf16.mxu0 %v1242_v16  ;;  %v1267_v39 = vld [vmem:[#allocation5 + $0x1b8] sm:$0xff]   ;;  %v1271_v43 = vld [vmem:[#allocation5 + $0x1b0] sm:$0xff]   ;;  %v1274_v46 = vld [vmem:[#allocation5 + $0x1e8] sm:$0xff]  }
  0x2d   :  { %1110 = vmatpush3.bf16.msra.mxu1 %v1241_v15  ;;  %v1275_v47 = vld [vmem:[#allocation5 + $0x1a8] sm:$0xff]   ;;  %v1276_v48 = vld [vmem:[#allocation5 + $0x160] sm:$0xff]   ;;  %v1280_v52 = vld [vmem:[#allocation5 + $0x158] sm:$0xff]  }
  0x2e   :  { %1111 = vmatprep.subr.bf16.mxu1 %v1244_v18  ;;  %v1277_v49 = vld [vmem:[#allocation5 + $0x120] sm:$0xff]   ;;  %v1281_v53 = vld [vmem:[#allocation5 + $0x118] sm:$0xff]   ;;  %v1286_v59 = vld [vmem:[#allocation5 + $0x150] sm:$0xff]  }
  0x2f   :  { %1084 = vmatpush3.bf16.msra.mxu0 %v1243_v17  ;;  %v1278_v50 = vld [vmem:[#allocation5 + $0x1e0] sm:$0xff]   ;;  %v1283_v56 = vld [vmem:[#allocation5 + $0x1d8] sm:$0xff]   ;;  %v1287_v60 = vld [vmem:[#allocation5 + $0x110] sm:$0xff]  }
  0x30   :  { %1085 = vmatprep.subr.bf16.mxu0 %v1246_v20  ;;  %v1279_v51 = vld [vmem:[#allocation5 + $0x1a0] sm:$0xff]   ;;  %v1285_v58 = vld [vmem:[#allocation5 + $0x198] sm:$0xff]   ;;  %v1288_v61 = vld [vmem:[#allocation5 + $0x1d0] sm:$0xff]  }
  0x31   :  { %1112 = vmatpush3.bf16.msra.mxu1 %v1245_v19  ;;  %v54_v54 = vld [vmem:[#allocation2 + $0x48] sm:$0xff]  ;;  %v1289_v62 = vld [vmem:[#allocation5 + $0x190] sm:$0xff]   ;;  %v55_v63 = vld [vmem:[#allocation2 + $0x50] sm:$0xff] }
  0x32   :  { %1113 = vmatprep.subr.bf16.mxu1 %v1248_v22  ;;  %v995_v55 = vcombine.high %v54_v54, %v54_v54  ;;  %v994_v57 = vcombine.low %v54_v54, %v54_v54  ;;  %v997_v0 = vcombine.high %v55_v63, %v55_v63  ;;  %v1291_v1 = vld [vmem:[#allocation5 + $0x148] sm:$0xff]   ;;  %v996_v2 = vcombine.low %v55_v63, %v55_v63  ;;  %v1296_v6 = vld [vmem:[#allocation5 + $0x140] sm:$0xff]   ;;  %v1303_v12 = vld [vmem:[#allocation5 + $0x238] sm:$0xff]  }
  0x33   :  { %1086 = vmatpush3.bf16.msra.mxu0 %v1247_v21  ;;  %v1293_v3 = vld [vmem:[#allocation5 + $0x108] sm:$0xff]   ;;  %v1297_v7 = vld [vmem:[#allocation5 + $0x100] sm:$0xff]   ;;  %v1306_v14 = vld [vmem:[#allocation2 + $0x1c] ss:$36 sps:$4 sm:$0xff]  }
  0x34   :  { %1087 = vmatprep.subr.bf16.mxu0 %v1250_v24  ;;  %v1294_v4 = vld [vmem:[#allocation5 + $0x1c8] sm:$0xff]   ;;  %v1298_v8 = vld [vmem:[#allocation5 + $0x1c0] sm:$0xff]   ;;  %v1307_v15 = vld [vmem:[#allocation5 + $0x230] sm:$0xff]  }
  0x35   :  { %1114 = vmatpush3.bf16.msra.mxu1 %v1249_v23  ;;  %v1295_v5 = vld [vmem:[#allocation5 + $0x188] sm:$0xff]   ;;  %v1302_v11 = vld [vmem:[#allocation5 + $0x180] sm:$0xff]   ;;  %v57_v19 = vld [vmem:[#allocation2 + $0x60] sm:$0xff] }
  0x36   :  { %1115 = vmatprep.subr.bf16.mxu1 %v1252_v26  ;;  %v1299_v9 = vld [vmem:[#allocation2 + $0x10] ss:$36 sps:$4 sm:$0xff]   ;;  %v1304_v13 = vld [vmem:[#allocation2 + $0x18] ss:$36 sps:$4 sm:$0xff]   ;;  %v1001_v21 = vcombine.high %v57_v19, %v57_v19  ;;  %v1000_v22 = vcombine.low %v57_v19, %v57_v19  ;;  %v1318_v24 = vld [vmem:[#allocation2 + $0x20] ss:$36 sps:$4 sm:$0xff]  }
  0x37   :  { %1088 = vmatpush3.bf16.msra.mxu0 %v1251_v25  ;;  %v1301_v10 = vld [vmem:[#allocation2 + $0x14] ss:$36 sps:$4 sm:$0xff]   ;;  %v1313_v23 = vld [vmem:[#allocation5 + $0x220] sm:$0xff]   ;;  %v1314_v25 = vld [vmem:[#allocation5 + $0x218] sm:$0xff]  }
  0x38   :  { %1089 = vmatprep.subr.bf16.mxu0 %v1254_v28  ;;  %v56_v16 = vld [vmem:[#allocation2 + $0x58] sm:$0xff]  ;;  %v1317_v28 = vld [vmem:[#allocation5 + $0x200] sm:$0xff]  }
  0x39   :  { %1116 = vmatpush3.bf16.msra.mxu1 %v1253_v27  ;;  %v999_v17 = vcombine.high %v56_v16, %v56_v16  ;;  %v1310_v18 = vld [vmem:[#allocation5 + $0x228] sm:$0xff]   ;;  %v998_v20 = vcombine.low %v56_v16, %v56_v16  ;;  %v1315_v26 = vld [vmem:[#allocation5 + $0x210] sm:$0xff]  }
  0x3a   :  { %1117 = vmatprep.subr.bf16.mxu1 %v1256_v30  ;;  %v1316_v27 = vld [vmem:[#allocation5 + $0x208] sm:$0xff]  }
  0x3b   :  { %1090 = vmatpush3.bf16.msra.mxu0 %v1255_v29  ;;  %v1319_v29 = vld [vmem:[#allocation2 + $0x68] ss:$0 sps:$4 sm:$0xff]  }
  0x3c   :  { %1131 = vmatprep.subr.bf16.mxu0 %v1261_v34 }
  0x3d   :  { %1118 = vmatpush3.bf16.msra.mxu1 %v1260_v33 }
  0x3e   :  { %753 = vmatmul.mubr.bf16.vlgmr.msra.gmra.mxu0 %v1257_v31  ;;  %1159 = vmatprep.subr.bf16.mxu1 %v1266_v38 }
  0x3f   :  { %1132 = vmatpush3.bf16.msra.mxu0 %v1265_v37  ;;  %760 = vmatprep.mubr.bf16.mxu0 %v995_v55 }
  0x40   :  { %801 = vmatmul.mubr.bf16.vlgmr.msra.gmra.mxu1 %v1262_v35  ;;  %1133 = vmatprep.subr.bf16.mxu0 %v1268_v40 }
  0x41   :  { %1160 = vmatpush3.bf16.msra.mxu1 %v1267_v39  ;;  %808 = vmatprep.mubr.bf16.mxu1 %v997_v0  ;;  %v984_v0 = vld [vmem:[%s1429_s2] ss:$0 sm:$0xff]  ;;  %s1392_s2 = smov [#allocation7]  }
  0x42   :  { %1161 = vmatprep.subr.bf16.mxu1 %v1270_v42  ;;  %s971_s26 = sshll.u32 %s1392_s2, 4  ;;  %s972_s26 = int_to_ptr.vmem [resolvable:$true] %s971_s26 }
  0x43   :  { %1134 = vmatpush3.bf16.msra.mxu0 %v1269_v41  ;;  %s1360_s27 = scalar_lea.vmem %s972_s26, 384  ;;  %p1365_p11 = scmp.lt.s32.totalorder %s972_s26, %s972_s26 }
  0x44   :  { %1135 = vmatprep.subr.bf16.mxu0 %v1272_v44  ;;  %p1361_p10 = scmp.ne.s32.totalorder %s972_s26, %s1360_s27  ;;  %p1366_p12 = scmp.lt.s32.totalorder %s1360_s27, %s1360_s27 }
  0x45   :  { %1162 = vmatpush3.bf16.msra.mxu1 %v1271_v43 }
  0x46   :  { %1163 = vmatprep.subr.bf16.mxu1 %v1274_v46  ;;  %761 = vmatmul.mubr.bf16.gmra.mxu0 %v994_v57  ;;  %p1367_p13 = por %p1366_p12, %p1365_p11 }
  0x47   :  { %1136 = vmatpush3.bf16.msra.mxu0 %v1273_v45  ;;  %848 = vmatprep.mubr.bf16.mxu0 %v1301_v10 }
  0x48   :  { %1137 = vmatprep.subr.bf16.mxu0 %v1276_v48  ;;  %809 = vmatmul.mubr.bf16.gmra.mxu1 %v996_v2  ;;  %p1368_p0 = pnand %p1367_p13, %p1361_p10 }
  0x49   :  { %1164 = vmatpush3.bf16.msra.mxu1 %v1275_v47  ;;  %896 = vmatprep.mubr.bf16.mxu1 %v1306_v14 }
  0x4a   :  { %1165 = vmatprep.subr.bf16.mxu1 %v1278_v50 }
  0x4b   :  { %1138 = vmatpush3.bf16.msra.mxu0 %v1277_v49 }
  0x4c   :  { %1139 = vmatprep.subr.bf16.mxu0 %v1280_v52 }
  0x4d   :  { %1166 = vmatpush3.bf16.msra.mxu1 %v1279_v51 }
  0x4e   :  { %1167 = vmatprep.subr.bf16.mxu1 %v1283_v56 }
  0x4f   :  { %1140 = vmatpush3.bf16.msra.mxu0 %v1281_v53 }
  0x50   :  { %1141 = vmatprep.subr.bf16.mxu0 %v1286_v59 }
  0x51   :  { %1168 = vmatpush3.bf16.msra.mxu1 %v1285_v58 }
  0x52   :  { %1169 = vmatprep.subr.bf16.mxu1 %v1288_v61 }
  0x53   :  { %1142 = vmatpush3.bf16.msra.mxu0 %v1287_v60 }
  0x54   :  { %1143 = vmatprep.subr.bf16.mxu0 %v1291_v1 }
  0x55   :  { %1170 = vmatpush3.bf16.msra.mxu1 %v1289_v62 }
  0x56   :  { %1171 = vmatprep.subr.bf16.mxu1 %v1294_v4 }
  0x57   :  { %1144 = vmatpush3.bf16.msra.mxu0 %v1293_v3 }
  0x58   :  { %1145 = vmatprep.subr.bf16.mxu0 %v1296_v6 }
  0x59   :  { %1172 = vmatpush3.bf16.msra.mxu1 %v1295_v5 }
  0x5a   :  { %1173 = vmatprep.subr.bf16.mxu1 %v1298_v8 }
  0x5b   :  { %1146 = vmatpush3.bf16.msra.mxu0 %v1297_v7 }
  0x5c   :  { %1197 = vmatprep.subr.bf16.mxu0 %v1303_v12 }
  0x5d   :  { %1174 = vmatpush3.bf16.msra.mxu1 %v1302_v11 }
  0x5e   :  { %849 = vmatmul.mubr.bf16.vlgmr.msra.gmra.mxu0 %v1299_v9 }
  0x5f   :  { %1198 = vmatpush3.bf16.msra.mxu0 %v1303_v12  ;;  %856 = vmatprep.mubr.bf16.mxu0 %v999_v17 }
  0x60   :  { %897 = vmatmul.mubr.bf16.vlgmr.msra.gmra.mxu1 %v1304_v13  ;;  %1199 = vmatprep.subr.bf16.mxu0 %v1307_v15 }
  0x61   :  { %904 = vmatprep.mubr.bf16.mxu1 %v1001_v21 }
  0x63   :  { %1200 = vmatpush3.bf16.msra.mxu0 %v1307_v15 }
  0x64   :  { %1201 = vmatprep.subr.bf16.mxu0 %v1310_v18 }
  0x66   :  { %857 = vmatmul.mubr.bf16.gmra.mxu0 %v998_v20 }
  0x67   :  { %1202 = vmatpush3.bf16.msra.mxu0 %v1310_v18  ;;  %1213 = vmatprep.mubr.bf16.mxu0 %v1318_v24 }
  0x68   :  { %905 = vmatmul.mubr.bf16.gmra.mxu1 %v1000_v22  ;;  %1203 = vmatprep.subr.bf16.mxu0 %v1313_v23 }
  0x6b   :  { %1204 = vmatpush3.bf16.msra.mxu0 %v1313_v23 }
  0x6c   :  { %1205 = vmatprep.subr.bf16.mxu0 %v1314_v25 }
  0x6f   :  { %1206 = vmatpush3.bf16.msra.mxu0 %v1314_v25 }
  0x70   :  { %1207 = vmatprep.subr.bf16.mxu0 %v1315_v26 }
  0x73   :  { %1208 = vmatpush3.bf16.msra.mxu0 %v1315_v26 }
  0x74   :  { %1209 = vmatprep.subr.bf16.mxu0 %v1316_v27 }
  0x77   :  { %1210 = vmatpush3.bf16.msra.mxu0 %v1316_v27 }
  0x78   :  { %1211 = vmatprep.subr.bf16.mxu0 %v1317_v28 }
  0x7b   :  { %1212 = vmatpush3.bf16.msra.mxu0 %v1317_v28 }
  0x7e   :  { %1214 = vmatmul.mubr.bf16.vlgmr.msra.gmra.mxu0 %v1319_v29 }
  0xfe   :  { %v1091_v30 = vpop.f32.mrf.mxu0 }
 0x100   :  { %v1092_v31 = vpop.f32.mrf.mxu0  ;;  %v1119_v32 = vpop.f32.mrf.mxu1 }
 0x101   :  { %v1093_v63 = vadd.f32 %v1092_v31, %v1091_v30 }
 0x102   :  { %v1094_v33 = vpop.f32.mrf.mxu0  ;;  %v1120_v34 = vpop.f32.mrf.mxu1 }
 0x103   :  { %v755_v3 = vadd.f32 %v1093_v63, %v984_v0  ;;  %v1121_v4 = vadd.f32 %v1120_v34, %v1119_v32 }
 0x104   :  { %v1095_v35 = vpop.f32.mrf.mxu0  ;;  %v1122_v37 = vpop.f32.mrf.mxu1 }
 0x105   :  { %v1096_v5 = vadd.f32 %v1095_v35, %v1094_v33  ;;  %v803_v9 = vadd.f32 %v1121_v4, %v755_v3 }
 0x106   :  { %v1097_v36 = vpop.f32.mrf.mxu0  ;;  %v1123_v40 = vpop.f32.mrf.mxu1 }
 0x107   :  { %v758_v10 = vadd.f32 %v1096_v5, %v984_v0  ;;  %v1124_v11 = vadd.f32 %v1123_v40, %v1122_v37 }
 0x108   :  { %v1098_v38 = vpop.f32.mrf.mxu0  ;;  %v1125_v42 = vpop.f32.mrf.mxu1 }
 0x109   :  { %v1099_v62 = vadd.f32 %v1098_v38, %v1097_v36  ;;  %v806_v17 = vadd.f32 %v1124_v11, %v758_v10 }
 0x10a   :  { %v1100_v39 = vpop.f32.mrf.mxu0  ;;  %v1126_v43 = vpop.f32.mrf.mxu1 }
 0x10b   :  { %v763_v1 = vadd.f32 %v1099_v62, %v984_v0  ;;  %v1127_v2 = vadd.f32 %v1126_v43, %v1125_v42 }
 0x10c   :  { %v1101_v41 = vpop.f32.mrf.mxu0  ;;  %v1128_v44 = vpop.f32.mrf.mxu1 }
 0x10d   :  { %v811_v7 = vadd.f32 %v1127_v2, %v763_v1 }
 0x10e   :  { %v1129_v45 = vpop.f32.mrf.mxu1 }
 0x11e   :  { %v1147_v46 = vpop.f32.mrf.mxu0 }
 0x120   :  { %v1148_v47 = vpop.f32.mrf.mxu0  ;;  %v1175_v48 = vpop.f32.mrf.mxu1 }
 0x121   :  { %v1149_v8 = vadd.f32 %v1148_v47, %v1147_v46 }
 0x122   :  { %v1150_v49 = vpop.f32.mrf.mxu0  ;;  %v1176_v50 = vpop.f32.mrf.mxu1 }
 0x123   :  { %v851_v14 = vadd.f32 %v1149_v8, %v803_v9  ;;  %v1177_v15 = vadd.f32 %v1176_v50, %v1175_v48 }
 0x124   :  { %v1151_v51 = vpop.f32.mrf.mxu0  ;;  %v1178_v52 = vpop.f32.mrf.mxu1 }
 0x125   :  { %v1152_v16 = vadd.f32 %v1151_v51, %v1150_v49  ;;  %v899_v23 = vadd.f32 %v1177_v15, %v851_v14 }
 0x126   :  { %v1153_v53 = vpop.f32.mrf.mxu0  ;;  %v1179_v54 = vpop.f32.mrf.mxu1 }
 0x127   :  { %v854_v20 = vadd.f32 %v1152_v16, %v806_v17  ;;  %v1180_v21 = vadd.f32 %v1179_v54, %v1178_v52 }
 0x128   :  { %v1154_v55 = vpop.f32.mrf.mxu0  ;;  %v1181_v56 = vpop.f32.mrf.mxu1 }
 0x129   :  { %v1155_v6 = vadd.f32 %v1154_v55, %v1153_v53  ;;  %v902_v29 = vadd.f32 %v1180_v21, %v854_v20 }
 0x12a   :  { %v1156_v57 = vpop.f32.mrf.mxu0  ;;  %v1182_v58 = vpop.f32.mrf.mxu1 }
 0x12b   :  { %v859_v12 = vadd.f32 %v1155_v6, %v811_v7  ;;  %v1183_v13 = vadd.f32 %v1182_v58, %v1181_v56 }
 0x12c   :  { %v1157_v59 = vpop.f32.mrf.mxu0  ;;  %v1184_v60 = vpop.f32.mrf.mxu1 }
 0x12d   :  { %v907_v18 = vadd.f32 %v1183_v13, %v859_v12 }
 0x12e   :  { %v1185_v61 = vpop.f32.mrf.mxu1 }
 0x13e   :  { %v1215_v19 = vpop.f32.mrf.mxu0 }
 0x13f   :  { %v955_v22 = vadd.f32 %v1215_v19, %v907_v18 }
 0x140   :  { %v946_v24 = vpop.f32.mrf.mxu0 }
 0x141   :  { %v962_v25 = vmax.f32 %v955_v22, 0.0  ;;  %v947_v26 = vadd.f32 %v946_v24, %v899_v23 }
 0x142   :  { %v1216_v27 = vpop.f32.mrf.mxu0 }
 0x143   :  { %965 = vst [vmem:[#allocation7 + $0x10] sm:$0xff] %v962_v25  ;;  %v960_v28 = vmax.f32 %v947_v26, 0.0 }
 0x144   :  { %v949_v30 = vpop.f32.mrf.mxu0 }
 0x145   :  { %963 = vst [vmem:[#allocation7] sm:$0xff] %v960_v28  ;;  %v950_v31 = vadd.f32 %v949_v30, %v902_v29 }
 0x147   :  { %v961_v32 = vmax.f32 %v950_v31, 0.0 }
 0x149   :  { %964 = vst [vmem:[#allocation7 + $0x8] sm:$0xff] %v961_v32 }
 0x14a   :  { %1371 = shalt.err (!%p1368_p0)
}
 0x14b   :  { %s1393_s28 = smov 128   ;;  %s1394_s29 = smov 8  }
 0x14c   :  { %977 = dma.vmem_to_hbm [thread:$0]  %s972_s26, 384, %s1430_s3, [#allocation4], %s1393_s28, %s1393_s28, %s1394_s29  }
 0x14d   :  { %1384 = dma.done.wait [#allocation4], 384  }
 0x14e   :  { %1385 = vsyncadd [#allocation4], 4294966912 }
 0x14f   :  { %981 = vsyncpa [#allocation3], 1 }
 0x150   :  { %982 = vsyncpa [#allocation6], 1 }
 0x151   :  { %983 = vsyncpa [#allocation4], 1 }

</bundles_post_ra>
